<compile_context>
chip_gen: v7x
topology: tpu7x:2x2x1
jax: 0.10.0
libtpu: 0.0.40
codegen_flags: <defaults>
</compile_context>

<pallas_src>
import functools

import jax
import jax.numpy as jnp
from jax.experimental import pallas as pl
from jax.experimental.pallas import tpu as pltpu


def _sigmoid(x):
    # tanh-based logistic: numerically stable, lowers to the EUP tanh unit.
    return 0.5 * (jnp.tanh(0.5 * x) + 1.0)


def rmtpp_kernel(
    time_hist_ref, ev_vec_ref, time_next_ref,
    te_w_ref,
    w_ih_ref, w_hh_ref, b_gates_ref,
    proj_w_ref, proj_b_ref,
    heads_w_ref, heads_b_ref,
    packed_ref,
    *, seq_len, batch, hidden_size, num_events,
    event_toggle, limited_history_norm, time_scalar_min,
):
    S, B, H, E = seq_len, batch, hidden_size, num_events

    # ---- input projection hoisted out of the recurrence --------------------
    # te_w already carries 1/var; te_b is folded into b_gates (wrapper).
    x = time_hist_ref[...] * te_w_ref[...] + ev_vec_ref[...]            # [S*B, I] f32
    # one [S*B, I] @ [I, 4H] bf16 matmul, f32 accumulate, fused biases.
    gx = (jnp.dot(x.astype(jnp.bfloat16), w_ih_ref[...],
                  preferred_element_type=jnp.float32)
          + b_gates_ref[...])                                            # [S*B, 4H] f32

    w_hh = w_hh_ref[...]                                                 # [H, 4H] bf16

    # ---- LSTM recurrence (single layer, zero initial state) ----------------
    # Only h @ W_hh remains on the serial chain; PyTorch gate order i, f, g, o.
    # S is static & small -> fully unrolled; gate slab / history live in vregs.
    h = jnp.zeros((B, H), jnp.float32)
    c = jnp.zeros((B, H), jnp.float32)
    hs = []
    for t in range(S):
        pre = gx[t * B:(t + 1) * B, :] + jnp.dot(
            h.astype(jnp.bfloat16), w_hh,
            preferred_element_type=jnp.float32)                          # [B, 4H] f32
        # two EUP pushes over the full 4H width, gates extracted by lane slice
        sig = _sigmoid(pre)
        tnh = jnp.tanh(pre)
        i_g = sig[:, 0 * H:1 * H]
        f_g = sig[:, 1 * H:2 * H]
        g_g = tnh[:, 2 * H:3 * H]
        o_g = sig[:, 3 * H:4 * H]
        c = f_g * c + i_g * g_g
        h = o_g * jnp.tanh(c)
        hs.append(h)
    hidden = jnp.concatenate(hs, axis=0)                                 # [S*B, H]

    # ---- project -> relu ----------------------------------------------------
    proj = jnp.dot(hidden.astype(jnp.bfloat16), proj_w_ref[...],
                   preferred_element_type=jnp.float32) + proj_b_ref[...]
    proj = jnp.maximum(proj, 0.0)                                        # [S*B, O]

    # ---- fused heads: [intensity, base_intensity, time_scalar, (logits...)] -
    heads = (jnp.dot(proj.astype(jnp.bfloat16), heads_w_ref[...],
                     preferred_element_type=jnp.float32)
             + heads_b_ref[...])                                         # [S*B, 3+E]

    hp = heads[:, 0:1]
    if limited_history_norm:
        hp = jnp.tanh(hp)
    hp = jnp.exp(hp)                                                     # history_part
    base = jnp.exp(heads[:, 1:2])
    constant = hp * base

    ts = heads[:, 2:3]
    # matches the module's (ts >= 0).int() - (ts < 0).int(): +1 at ts == 0
    sign = jnp.where(ts >= 0.0, 1.0, -1.0)
    ts = jnp.maximum(jnp.abs(ts), time_scalar_min) * sign

    tn = time_next_ref[...]                                              # [S*B, 1]
    inten = jnp.exp(ts * tn) * constant
    integ = (inten - constant) / ts

    # packed output columns: 0=integral, 1=intensity, 2=history_part, 3:=mark
    if event_toggle:
        logits = heads[:, 3:3 + E]
        m = jnp.max(logits, axis=-1, keepdims=True)
        e = jnp.exp(logits - m)
        probs = e / jnp.sum(e, axis=-1, keepdims=True)                   # exact softmax
        out = jnp.concatenate([integ, inten, hp, probs], axis=1)
    else:
        out = jnp.concatenate([integ, inten, hp], axis=1)
    packed_ref[...] = out                                                # single store


def rmtpp_forward(params, events_history, time_history, time_next, mean, var,
                  *, event_toggle=True, limited_history_norm=True,
                  time_scalar_min=1e-3):
    # NOTE: `mean` is accepted but unused, exactly like the PyTorch reference
    # (forward only divides by `var`).
    B, S = time_history.shape
    I = params["te_w"].shape[1]
    H = params["w_hh"].shape[0]
    E = params["em_w"].shape[1]

    # sequence-major flat layout [S*B, .]; 1/var folded into te_w for history
    th = time_history.astype(jnp.float32).T.reshape(S * B, 1)
    tn = (time_next / var).astype(jnp.float32).T.reshape(S * B, 1)

    if event_toggle:
        ev = jnp.take(params["emb"], events_history, axis=0)            # [B, S, I]
    else:
        ev = jnp.zeros((B, S, I), jnp.float32)
    ev = jnp.transpose(ev, (1, 0, 2)).reshape(S * B, I)                  # S-major flat

    # 1/var folded into time-embedding weight; te_b folded through W_ih.
    te_w_s = (params["te_w"] / var).astype(jnp.float32)                  # [1, I]
    b_gates = (params["b_ih"] + params["b_hh"]
               + jnp.dot(params["te_b"], params["w_ih"]))                # [1, 4H] f32

    # fused output heads
    head_ws = [params["int_w"], params["base_w"], params["ts_w"]]
    head_bs = [params["int_b"], params["base_b"], params["ts_b"]]
    if event_toggle:
        head_ws.append(params["em_w"])
        head_bs.append(params["em_b"])
    heads_w = jnp.concatenate(head_ws, axis=1)                           # [O, NH]
    heads_b = jnp.concatenate(head_bs, axis=1)                           # [1, NH]
    NP = heads_w.shape[1]                                                # 3 (+E)

    # bf16 matmul operands (MXU-native on v5e/v6e/v7x), f32 accumulation.
    w_ih_bf = params["w_ih"].astype(jnp.bfloat16)
    w_hh_bf = params["w_hh"].astype(jnp.bfloat16)
    proj_w_bf = params["proj_w"].astype(jnp.bfloat16)
    heads_w_bf = heads_w.astype(jnp.bfloat16)

    kernel = functools.partial(
        rmtpp_kernel,
        seq_len=S, batch=B, hidden_size=H, num_events=E,
        event_toggle=event_toggle,
        limited_history_norm=limited_history_norm,
        time_scalar_min=time_scalar_min,
    )

    # generation-aware VMEM budget: ~2x the resident footprint, capped well
    # below the physical capacity (leaves Mosaic scratch headroom on v7x).
    f32b, bf16b = 4, 2
    O = params["proj_w"].shape[1]
    est = (
        f32b * (th.size + tn.size + ev.size + te_w_s.size + b_gates.size
                + params["proj_b"].size + heads_b.size
                + S * B * NP                      # packed output
                + S * B * 4 * H + S * B * max(I, O, H))   # live working set
        + bf16b * (w_ih_bf.size + w_hh_bf.size + proj_w_bf.size + heads_w_bf.size)
    )
    try:
        vmem_cap = int(getattr(pltpu.get_tpu_info(), "vmem_capacity_bytes",
                               64 * 1024 * 1024))
    except Exception:  # pragma: no cover - conservative fallback
        vmem_cap = 64 * 1024 * 1024
    vmem_limit = int(min(int(0.75 * vmem_cap), max(4 * 1024 * 1024, 2 * est)))

    vmem_spec = pl.BlockSpec(memory_space=pltpu.MemorySpace.VMEM)

    packed = pl.pallas_call(
        kernel,
        out_shape=jax.ShapeDtypeStruct((S * B, NP), jnp.float32),
        in_specs=[vmem_spec] * 11,
        out_specs=vmem_spec,
        compiler_params=pltpu.CompilerParams(vmem_limit_bytes=vmem_limit),
    )(th, ev, tn,
      te_w_s,
      w_ih_bf, w_hh_bf, b_gates,
      proj_w_bf, params["proj_b"],
      heads_w_bf, heads_b)

    # back to batch-first [B, S, ...]
    packed = jnp.transpose(packed.reshape(S, B, NP), (1, 0, 2))          # [B, S, NP]
    integ = packed[..., 0]
    inten = packed[..., 1]
    hp = packed[..., 2:3]

    if event_toggle:
        # torch sums intensity/integral over the trailing size-1 dim -> [B, S]
        mark = packed[..., 3:3 + E]
        return integ, inten, mark, hp
    else:
        return integ[..., None], inten[..., None], None, hp


def init_params(key, input_size, hidden_size, output_size, num_events):
    I, H, O, E = input_size, hidden_size, output_size, num_events
    ks = jax.random.split(key, 17)

    def lin(k, fan_in, shape):
        bound = 1.0 / jnp.sqrt(jnp.float32(fan_in))
        return jax.random.uniform(k, shape, jnp.float32, -bound, bound)

    params = dict(
        # time_embedding: Linear(1, I) -> weight stored transposed [1, I]
        te_w=lin(ks[0], 1, (1, I)),
        te_b=lin(ks[1], 1, (1, I)),
        # LSTM weights, transposed + gate-concatenated (PyTorch order i, f, g, o)
        w_ih=lin(ks[2], H, (I, 4 * H)),
        w_hh=lin(ks[3], H, (H, 4 * H)),
        b_ih=lin(ks[4], H, (1, 4 * H)),
        b_hh=lin(ks[5], H, (1, 4 * H)),
        # project: Linear(H, O)
        proj_w=lin(ks[6], H, (H, O)),
        proj_b=lin(ks[7], H, (1, O)),
        # intensity / base_intensity / time_scalar heads: Linear(O, 1)
        int_w=lin(ks[8], O, (O, 1)),
        int_b=lin(ks[9], O, (1, 1)),
        base_w=lin(ks[10], O, (O, 1)),
        base_b=lin(ks[11], O, (1, 1)),
        ts_w=lin(ks[12], O, (O, 1)),
        ts_b=lin(ks[13], O, (1, 1)),
        # event_mapper: Linear(O, E)
        em_w=lin(ks[14], O, (O, E)),
        em_b=lin(ks[15], O, (1, E)),
    )
    emb = jax.random.normal(ks[16], (E + 1, I), jnp.float32) * 0.1
    emb = emb.at[E].set(0.0)   # padding_idx = num_events
    params["emb"] = emb
    return params


if __name__ == "__main__":
    key = jax.random.PRNGKey(0)
    B, S = 2, 8
    input_size = 32
    hidden_size = 32
    output_size = 32
    num_events = 5

    pkey, k1, k2, k3 = jax.random.split(key, 4)
    params = init_params(pkey, input_size, hidden_size, output_size, num_events)

    events_history = jax.random.randint(k1, (B, S), 0, num_events)
    time_history = jax.random.uniform(k2, (B, S), jnp.float32, 0.1, 1.0)
    time_next = jax.random.uniform(k3, (B, S), jnp.float32, 0.1, 1.0)
    mean, var = 0.0, 2.0

    integral, intensity, mark, history_part = rmtpp_forward(
        params, events_history, time_history, time_next, mean, var,
        event_toggle=True, limited_history_norm=True, time_scalar_min=1e-3)

    jax.block_until_ready((integral, intensity, mark, history_part))
    assert integral.shape == (B, S)
    assert intensity.shape == (B, S)
    assert mark.shape == (B, S, num_events)
    assert history_part.shape == (B, S, 1)
    assert bool(jnp.all(jnp.isfinite(integral)))
    assert bool(jnp.all(jnp.isfinite(intensity)))
    assert bool(jnp.all(jnp.isfinite(mark)))
    assert bool(jnp.all(jnp.abs(jnp.sum(mark, axis=-1) - 1.0) < 1e-3))
    print("KERNEL_OK")
</pallas_src>

<mosaic_0001>
module attributes {stable_mosaic.version = 11 : i64} {
  func.func @rmtpp_kernel(%arg0: memref<16x1xf32, #tpu.memory_space<vmem>>, %arg1: memref<16x32xf32, #tpu.memory_space<vmem>>, %arg2: memref<16x1xf32, #tpu.memory_space<vmem>>, %arg3: memref<1x32xf32, #tpu.memory_space<vmem>>, %arg4: memref<32x128xbf16, #tpu.memory_space<vmem>>, %arg5: memref<32x128xbf16, #tpu.memory_space<vmem>>, %arg6: memref<1x128xf32, #tpu.memory_space<vmem>>, %arg7: memref<32x32xbf16, #tpu.memory_space<vmem>>, %arg8: memref<1x32xf32, #tpu.memory_space<vmem>>, %arg9: memref<32x8xbf16, #tpu.memory_space<vmem>>, %arg10: memref<1x8xf32, #tpu.memory_space<vmem>>, %arg11: memref<16x8xf32, #tpu.memory_space<vmem>>) attributes {dimension_semantics = [], scalar_prefetch = 0 : i64, scratch_operands = 0 : i64, tpu.core_type = #tpu.core_type<tc>} {
    %c0 = arith.constant 0 : index
    %c0_0 = arith.constant 0 : index
    %0 = vector.load %arg0[%c0, %c0_0] : memref<16x1xf32, #tpu.memory_space<vmem>>, vector<16x1xf32>
    %c0_1 = arith.constant 0 : index
    %c0_2 = arith.constant 0 : index
    %1 = vector.load %arg3[%c0_1, %c0_2] : memref<1x32xf32, #tpu.memory_space<vmem>>, vector<1x32xf32>
    %2 = vector.broadcast %0 : vector<16x1xf32> to vector<16x32xf32>
    %3 = vector.broadcast %1 : vector<1x32xf32> to vector<16x32xf32>
    %4 = arith.mulf %2, %3 : vector<16x32xf32>
    %c0_3 = arith.constant 0 : index
    %c0_4 = arith.constant 0 : index
    %5 = vector.load %arg1[%c0_3, %c0_4] : memref<16x32xf32, #tpu.memory_space<vmem>>, vector<16x32xf32>
    %6 = arith.addf %4, %5 : vector<16x32xf32>
    %7 = arith.truncf %6 : vector<16x32xf32> to vector<16x32xbf16>
    %c0_5 = arith.constant 0 : index
    %c0_6 = arith.constant 0 : index
    %8 = vector.load %arg4[%c0_5, %c0_6] : memref<32x128xbf16, #tpu.memory_space<vmem>>, vector<32x128xbf16>
    %cst = arith.constant dense<0.000000e+00> : vector<16x128xf32>
    %9 = tpu.matmul %7, %8, %cst {dimension_numbers = #tpu.dot_dimension_numbers<[1], [0], [0], [1], [0, 0, 1, 1], [], []>} : vector<16x32xbf16>, vector<32x128xbf16>, vector<16x128xf32> -> vector<16x128xf32>
    %c0_7 = arith.constant 0 : index
    %c0_8 = arith.constant 0 : index
    %10 = vector.load %arg6[%c0_7, %c0_8] : memref<1x128xf32, #tpu.memory_space<vmem>>, vector<1x128xf32>
    %11 = vector.broadcast %10 : vector<1x128xf32> to vector<16x128xf32>
    %12 = arith.addf %9, %11 : vector<16x128xf32>
    %c0_9 = arith.constant 0 : index
    %c0_10 = arith.constant 0 : index
    %13 = vector.load %arg5[%c0_9, %c0_10] : memref<32x128xbf16, #tpu.memory_space<vmem>>, vector<32x128xbf16>
    %cst_11 = arith.constant 0.000000e+00 : f32
    %14 = vector.broadcast %cst_11 : f32 to vector<2x32xf32>
    %cst_12 = arith.constant 0.000000e+00 : f32
    %15 = vector.broadcast %cst_12 : f32 to vector<2x32xf32>
    %16 = vector.extract_strided_slice %12 {offsets = [0, 0], sizes = [2, 128], strides = [1, 1]} : vector<16x128xf32> to vector<2x128xf32>
    %17 = arith.truncf %14 : vector<2x32xf32> to vector<2x32xbf16>
    %cst_13 = arith.constant dense<0.000000e+00> : vector<2x128xf32>
    %18 = tpu.matmul %17, %13, %cst_13 {dimension_numbers = #tpu.dot_dimension_numbers<[1], [0], [0], [1], [0, 0, 1, 1], [], []>} : vector<2x32xbf16>, vector<32x128xbf16>, vector<2x128xf32> -> vector<2x128xf32>
    %19 = arith.addf %16, %18 : vector<2x128xf32>
    %cst_14 = arith.constant 5.000000e-01 : f32
    %20 = vector.broadcast %cst_14 : f32 to vector<2x128xf32>
    %21 = arith.mulf %20, %19 : vector<2x128xf32>
    %22 = math.tanh %21 : vector<2x128xf32>
    %cst_15 = arith.constant 1.000000e+00 : f32
    %23 = vector.broadcast %cst_15 : f32 to vector<2x128xf32>
    %24 = arith.addf %22, %23 : vector<2x128xf32>
    %cst_16 = arith.constant 5.000000e-01 : f32
    %25 = vector.broadcast %cst_16 : f32 to vector<2x128xf32>
    %26 = arith.mulf %25, %24 : vector<2x128xf32>
    %27 = math.tanh %19 : vector<2x128xf32>
    %28 = vector.extract_strided_slice %26 {offsets = [0, 0], sizes = [2, 32], strides = [1, 1]} : vector<2x128xf32> to vector<2x32xf32>
    %29 = vector.extract_strided_slice %26 {offsets = [0, 32], sizes = [2, 32], strides = [1, 1]} : vector<2x128xf32> to vector<2x32xf32>
    %30 = vector.extract_strided_slice %27 {offsets = [0, 64], sizes = [2, 32], strides = [1, 1]} : vector<2x128xf32> to vector<2x32xf32>
    %31 = vector.extract_strided_slice %26 {offsets = [0, 96], sizes = [2, 32], strides = [1, 1]} : vector<2x128xf32> to vector<2x32xf32>
    %32 = arith.mulf %29, %15 : vector<2x32xf32>
    %33 = arith.mulf %28, %30 : vector<2x32xf32>
    %34 = arith.addf %32, %33 : vector<2x32xf32>
    %35 = math.tanh %34 : vector<2x32xf32>
    %36 = arith.mulf %31, %35 : vector<2x32xf32>
    %37 = vector.extract_strided_slice %12 {offsets = [2, 0], sizes = [2, 128], strides = [1, 1]} : vector<16x128xf32> to vector<2x128xf32>
    %38 = arith.truncf %36 : vector<2x32xf32> to vector<2x32xbf16>
    %cst_17 = arith.constant dense<0.000000e+00> : vector<2x128xf32>
    %39 = tpu.matmul %38, %13, %cst_17 {dimension_numbers = #tpu.dot_dimension_numbers<[1], [0], [0], [1], [0, 0, 1, 1], [], []>} : vector<2x32xbf16>, vector<32x128xbf16>, vector<2x128xf32> -> vector<2x128xf32>
    %40 = arith.addf %37, %39 : vector<2x128xf32>
    %cst_18 = arith.constant 5.000000e-01 : f32
    %41 = vector.broadcast %cst_18 : f32 to vector<2x128xf32>
    %42 = arith.mulf %41, %40 : vector<2x128xf32>
    %43 = math.tanh %42 : vector<2x128xf32>
    %cst_19 = arith.constant 1.000000e+00 : f32
    %44 = vector.broadcast %cst_19 : f32 to vector<2x128xf32>
    %45 = arith.addf %43, %44 : vector<2x128xf32>
    %cst_20 = arith.constant 5.000000e-01 : f32
    %46 = vector.broadcast %cst_20 : f32 to vector<2x128xf32>
    %47 = arith.mulf %46, %45 : vector<2x128xf32>
    %48 = math.tanh %40 : vector<2x128xf32>
    %49 = vector.extract_strided_slice %47 {offsets = [0, 0], sizes = [2, 32], strides = [1, 1]} : vector<2x128xf32> to vector<2x32xf32>
    %50 = vector.extract_strided_slice %47 {offsets = [0, 32], sizes = [2, 32], strides = [1, 1]} : vector<2x128xf32> to vector<2x32xf32>
    %51 = vector.extract_strided_slice %48 {offsets = [0, 64], sizes = [2, 32], strides = [1, 1]} : vector<2x128xf32> to vector<2x32xf32>
    %52 = vector.extract_strided_slice %47 {offsets = [0, 96], sizes = [2, 32], strides = [1, 1]} : vector<2x128xf32> to vector<2x32xf32>
    %53 = arith.mulf %50, %34 : vector<2x32xf32>
    %54 = arith.mulf %49, %51 : vector<2x32xf32>
    %55 = arith.addf %53, %54 : vector<2x32xf32>
    %56 = math.tanh %55 : vector<2x32xf32>
    %57 = arith.mulf %52, %56 : vector<2x32xf32>
    %58 = vector.extract_strided_slice %12 {offsets = [4, 0], sizes = [2, 128], strides = [1, 1]} : vector<16x128xf32> to vector<2x128xf32>
    %59 = arith.truncf %57 : vector<2x32xf32> to vector<2x32xbf16>
    %cst_21 = arith.constant dense<0.000000e+00> : vector<2x128xf32>
    %60 = tpu.matmul %59, %13, %cst_21 {dimension_numbers = #tpu.dot_dimension_numbers<[1], [0], [0], [1], [0, 0, 1, 1], [], []>} : vector<2x32xbf16>, vector<32x128xbf16>, vector<2x128xf32> -> vector<2x128xf32>
    %61 = arith.addf %58, %60 : vector<2x128xf32>
    %cst_22 = arith.constant 5.000000e-01 : f32
    %62 = vector.broadcast %cst_22 : f32 to vector<2x128xf32>
    %63 = arith.mulf %62, %61 : vector<2x128xf32>
    %64 = math.tanh %63 : vector<2x128xf32>
    %cst_23 = arith.constant 1.000000e+00 : f32
    %65 = vector.broadcast %cst_23 : f32 to vector<2x128xf32>
    %66 = arith.addf %64, %65 : vector<2x128xf32>
    %cst_24 = arith.constant 5.000000e-01 : f32
    %67 = vector.broadcast %cst_24 : f32 to vector<2x128xf32>
    %68 = arith.mulf %67, %66 : vector<2x128xf32>
    %69 = math.tanh %61 : vector<2x128xf32>
    %70 = vector.extract_strided_slice %68 {offsets = [0, 0], sizes = [2, 32], strides = [1, 1]} : vector<2x128xf32> to vector<2x32xf32>
    %71 = vector.extract_strided_slice %68 {offsets = [0, 32], sizes = [2, 32], strides = [1, 1]} : vector<2x128xf32> to vector<2x32xf32>
    %72 = vector.extract_strided_slice %69 {offsets = [0, 64], sizes = [2, 32], strides = [1, 1]} : vector<2x128xf32> to vector<2x32xf32>
    %73 = vector.extract_strided_slice %68 {offsets = [0, 96], sizes = [2, 32], strides = [1, 1]} : vector<2x128xf32> to vector<2x32xf32>
    %74 = arith.mulf %71, %55 : vector<2x32xf32>
    %75 = arith.mulf %70, %72 : vector<2x32xf32>
    %76 = arith.addf %74, %75 : vector<2x32xf32>
    %77 = math.tanh %76 : vector<2x32xf32>
    %78 = arith.mulf %73, %77 : vector<2x32xf32>
    %79 = vector.extract_strided_slice %12 {offsets = [6, 0], sizes = [2, 128], strides = [1, 1]} : vector<16x128xf32> to vector<2x128xf32>
    %80 = arith.truncf %78 : vector<2x32xf32> to vector<2x32xbf16>
    %cst_25 = arith.constant dense<0.000000e+00> : vector<2x128xf32>
    %81 = tpu.matmul %80, %13, %cst_25 {dimension_numbers = #tpu.dot_dimension_numbers<[1], [0], [0], [1], [0, 0, 1, 1], [], []>} : vector<2x32xbf16>, vector<32x128xbf16>, vector<2x128xf32> -> vector<2x128xf32>
    %82 = arith.addf %79, %81 : vector<2x128xf32>
    %cst_26 = arith.constant 5.000000e-01 : f32
    %83 = vector.broadcast %cst_26 : f32 to vector<2x128xf32>
    %84 = arith.mulf %83, %82 : vector<2x128xf32>
    %85 = math.tanh %84 : vector<2x128xf32>
    %cst_27 = arith.constant 1.000000e+00 : f32
    %86 = vector.broadcast %cst_27 : f32 to vector<2x128xf32>
    %87 = arith.addf %85, %86 : vector<2x128xf32>
    %cst_28 = arith.constant 5.000000e-01 : f32
    %88 = vector.broadcast %cst_28 : f32 to vector<2x128xf32>
    %89 = arith.mulf %88, %87 : vector<2x128xf32>
    %90 = math.tanh %82 : vector<2x128xf32>
    %91 = vector.extract_strided_slice %89 {offsets = [0, 0], sizes = [2, 32], strides = [1, 1]} : vector<2x128xf32> to vector<2x32xf32>
    %92 = vector.extract_strided_slice %89 {offsets = [0, 32], sizes = [2, 32], strides = [1, 1]} : vector<2x128xf32> to vector<2x32xf32>
    %93 = vector.extract_strided_slice %90 {offsets = [0, 64], sizes = [2, 32], strides = [1, 1]} : vector<2x128xf32> to vector<2x32xf32>
    %94 = vector.extract_strided_slice %89 {offsets = [0, 96], sizes = [2, 32], strides = [1, 1]} : vector<2x128xf32> to vector<2x32xf32>
    %95 = arith.mulf %92, %76 : vector<2x32xf32>
    %96 = arith.mulf %91, %93 : vector<2x32xf32>
    %97 = arith.addf %95, %96 : vector<2x32xf32>
    %98 = math.tanh %97 : vector<2x32xf32>
    %99 = arith.mulf %94, %98 : vector<2x32xf32>
    %100 = vector.extract_strided_slice %12 {offsets = [8, 0], sizes = [2, 128], strides = [1, 1]} : vector<16x128xf32> to vector<2x128xf32>
    %101 = arith.truncf %99 : vector<2x32xf32> to vector<2x32xbf16>
    %cst_29 = arith.constant dense<0.000000e+00> : vector<2x128xf32>
    %102 = tpu.matmul %101, %13, %cst_29 {dimension_numbers = #tpu.dot_dimension_numbers<[1], [0], [0], [1], [0, 0, 1, 1], [], []>} : vector<2x32xbf16>, vector<32x128xbf16>, vector<2x128xf32> -> vector<2x128xf32>
    %103 = arith.addf %100, %102 : vector<2x128xf32>
    %cst_30 = arith.constant 5.000000e-01 : f32
    %104 = vector.broadcast %cst_30 : f32 to vector<2x128xf32>
    %105 = arith.mulf %104, %103 : vector<2x128xf32>
    %106 = math.tanh %105 : vector<2x128xf32>
    %cst_31 = arith.constant 1.000000e+00 : f32
    %107 = vector.broadcast %cst_31 : f32 to vector<2x128xf32>
    %108 = arith.addf %106, %107 : vector<2x128xf32>
    %cst_32 = arith.constant 5.000000e-01 : f32
    %109 = vector.broadcast %cst_32 : f32 to vector<2x128xf32>
    %110 = arith.mulf %109, %108 : vector<2x128xf32>
    %111 = math.tanh %103 : vector<2x128xf32>
    %112 = vector.extract_strided_slice %110 {offsets = [0, 0], sizes = [2, 32], strides = [1, 1]} : vector<2x128xf32> to vector<2x32xf32>
    %113 = vector.extract_strided_slice %110 {offsets = [0, 32], sizes = [2, 32], strides = [1, 1]} : vector<2x128xf32> to vector<2x32xf32>
    %114 = vector.extract_strided_slice %111 {offsets = [0, 64], sizes = [2, 32], strides = [1, 1]} : vector<2x128xf32> to vector<2x32xf32>
    %115 = vector.extract_strided_slice %110 {offsets = [0, 96], sizes = [2, 32], strides = [1, 1]} : vector<2x128xf32> to vector<2x32xf32>
    %116 = arith.mulf %113, %97 : vector<2x32xf32>
    %117 = arith.mulf %112, %114 : vector<2x32xf32>
    %118 = arith.addf %116, %117 : vector<2x32xf32>
    %119 = math.tanh %118 : vector<2x32xf32>
    %120 = arith.mulf %115, %119 : vector<2x32xf32>
    %121 = vector.extract_strided_slice %12 {offsets = [10, 0], sizes = [2, 128], strides = [1, 1]} : vector<16x128xf32> to vector<2x128xf32>
    %122 = arith.truncf %120 : vector<2x32xf32> to vector<2x32xbf16>
    %cst_33 = arith.constant dense<0.000000e+00> : vector<2x128xf32>
    %123 = tpu.matmul %122, %13, %cst_33 {dimension_numbers = #tpu.dot_dimension_numbers<[1], [0], [0], [1], [0, 0, 1, 1], [], []>} : vector<2x32xbf16>, vector<32x128xbf16>, vector<2x128xf32> -> vector<2x128xf32>
    %124 = arith.addf %121, %123 : vector<2x128xf32>
    %cst_34 = arith.constant 5.000000e-01 : f32
    %125 = vector.broadcast %cst_34 : f32 to vector<2x128xf32>
    %126 = arith.mulf %125, %124 : vector<2x128xf32>
    %127 = math.tanh %126 : vector<2x128xf32>
    %cst_35 = arith.constant 1.000000e+00 : f32
    %128 = vector.broadcast %cst_35 : f32 to vector<2x128xf32>
    %129 = arith.addf %127, %128 : vector<2x128xf32>
    %cst_36 = arith.constant 5.000000e-01 : f32
    %130 = vector.broadcast %cst_36 : f32 to vector<2x128xf32>
    %131 = arith.mulf %130, %129 : vector<2x128xf32>
    %132 = math.tanh %124 : vector<2x128xf32>
    %133 = vector.extract_strided_slice %131 {offsets = [0, 0], sizes = [2, 32], strides = [1, 1]} : vector<2x128xf32> to vector<2x32xf32>
    %134 = vector.extract_strided_slice %131 {offsets = [0, 32], sizes = [2, 32], strides = [1, 1]} : vector<2x128xf32> to vector<2x32xf32>
    %135 = vector.extract_strided_slice %132 {offsets = [0, 64], sizes = [2, 32], strides = [1, 1]} : vector<2x128xf32> to vector<2x32xf32>
    %136 = vector.extract_strided_slice %131 {offsets = [0, 96], sizes = [2, 32], strides = [1, 1]} : vector<2x128xf32> to vector<2x32xf32>
    %137 = arith.mulf %134, %118 : vector<2x32xf32>
    %138 = arith.mulf %133, %135 : vector<2x32xf32>
    %139 = arith.addf %137, %138 : vector<2x32xf32>
    %140 = math.tanh %139 : vector<2x32xf32>
    %141 = arith.mulf %136, %140 : vector<2x32xf32>
    %142 = vector.extract_strided_slice %12 {offsets = [12, 0], sizes = [2, 128], strides = [1, 1]} : vector<16x128xf32> to vector<2x128xf32>
    %143 = arith.truncf %141 : vector<2x32xf32> to vector<2x32xbf16>
    %cst_37 = arith.constant dense<0.000000e+00> : vector<2x128xf32>
    %144 = tpu.matmul %143, %13, %cst_37 {dimension_numbers = #tpu.dot_dimension_numbers<[1], [0], [0], [1], [0, 0, 1, 1], [], []>} : vector<2x32xbf16>, vector<32x128xbf16>, vector<2x128xf32> -> vector<2x128xf32>
    %145 = arith.addf %142, %144 : vector<2x128xf32>
    %cst_38 = arith.constant 5.000000e-01 : f32
    %146 = vector.broadcast %cst_38 : f32 to vector<2x128xf32>
    %147 = arith.mulf %146, %145 : vector<2x128xf32>
    %148 = math.tanh %147 : vector<2x128xf32>
    %cst_39 = arith.constant 1.000000e+00 : f32
    %149 = vector.broadcast %cst_39 : f32 to vector<2x128xf32>
    %150 = arith.addf %148, %149 : vector<2x128xf32>
    %cst_40 = arith.constant 5.000000e-01 : f32
    %151 = vector.broadcast %cst_40 : f32 to vector<2x128xf32>
    %152 = arith.mulf %151, %150 : vector<2x128xf32>
    %153 = math.tanh %145 : vector<2x128xf32>
    %154 = vector.extract_strided_slice %152 {offsets = [0, 0], sizes = [2, 32], strides = [1, 1]} : vector<2x128xf32> to vector<2x32xf32>
    %155 = vector.extract_strided_slice %152 {offsets = [0, 32], sizes = [2, 32], strides = [1, 1]} : vector<2x128xf32> to vector<2x32xf32>
    %156 = vector.extract_strided_slice %153 {offsets = [0, 64], sizes = [2, 32], strides = [1, 1]} : vector<2x128xf32> to vector<2x32xf32>
    %157 = vector.extract_strided_slice %152 {offsets = [0, 96], sizes = [2, 32], strides = [1, 1]} : vector<2x128xf32> to vector<2x32xf32>
    %158 = arith.mulf %155, %139 : vector<2x32xf32>
    %159 = arith.mulf %154, %156 : vector<2x32xf32>
    %160 = arith.addf %158, %159 : vector<2x32xf32>
    %161 = math.tanh %160 : vector<2x32xf32>
    %162 = arith.mulf %157, %161 : vector<2x32xf32>
    %163 = vector.extract_strided_slice %12 {offsets = [14, 0], sizes = [2, 128], strides = [1, 1]} : vector<16x128xf32> to vector<2x128xf32>
    %164 = arith.truncf %162 : vector<2x32xf32> to vector<2x32xbf16>
    %cst_41 = arith.constant dense<0.000000e+00> : vector<2x128xf32>
    %165 = tpu.matmul %164, %13, %cst_41 {dimension_numbers = #tpu.dot_dimension_numbers<[1], [0], [0], [1], [0, 0, 1, 1], [], []>} : vector<2x32xbf16>, vector<32x128xbf16>, vector<2x128xf32> -> vector<2x128xf32>
    %166 = arith.addf %163, %165 : vector<2x128xf32>
    %cst_42 = arith.constant 5.000000e-01 : f32
    %167 = vector.broadcast %cst_42 : f32 to vector<2x128xf32>
    %168 = arith.mulf %167, %166 : vector<2x128xf32>
    %169 = math.tanh %168 : vector<2x128xf32>
    %cst_43 = arith.constant 1.000000e+00 : f32
    %170 = vector.broadcast %cst_43 : f32 to vector<2x128xf32>
    %171 = arith.addf %169, %170 : vector<2x128xf32>
    %cst_44 = arith.constant 5.000000e-01 : f32
    %172 = vector.broadcast %cst_44 : f32 to vector<2x128xf32>
    %173 = arith.mulf %172, %171 : vector<2x128xf32>
    %174 = math.tanh %166 : vector<2x128xf32>
    %175 = vector.extract_strided_slice %173 {offsets = [0, 0], sizes = [2, 32], strides = [1, 1]} : vector<2x128xf32> to vector<2x32xf32>
    %176 = vector.extract_strided_slice %173 {offsets = [0, 32], sizes = [2, 32], strides = [1, 1]} : vector<2x128xf32> to vector<2x32xf32>
    %177 = vector.extract_strided_slice %174 {offsets = [0, 64], sizes = [2, 32], strides = [1, 1]} : vector<2x128xf32> to vector<2x32xf32>
    %178 = vector.extract_strided_slice %173 {offsets = [0, 96], sizes = [2, 32], strides = [1, 1]} : vector<2x128xf32> to vector<2x32xf32>
    %179 = arith.mulf %176, %160 : vector<2x32xf32>
    %180 = arith.mulf %175, %177 : vector<2x32xf32>
    %181 = arith.addf %179, %180 : vector<2x32xf32>
    %182 = math.tanh %181 : vector<2x32xf32>
    %183 = arith.mulf %178, %182 : vector<2x32xf32>
    %184 = tpu.concatenate %36, %57, %78, %99, %120, %141, %162, %183 in 0 : vector<2x32xf32>, vector<2x32xf32>, vector<2x32xf32>, vector<2x32xf32>, vector<2x32xf32>, vector<2x32xf32>, vector<2x32xf32>, vector<2x32xf32> -> vector<16x32xf32>
    %185 = arith.truncf %184 : vector<16x32xf32> to vector<16x32xbf16>
    %c0_45 = arith.constant 0 : index
    %c0_46 = arith.constant 0 : index
    %186 = vector.load %arg7[%c0_45, %c0_46] : memref<32x32xbf16, #tpu.memory_space<vmem>>, vector<32x32xbf16>
    %cst_47 = arith.constant dense<0.000000e+00> : vector<16x32xf32>
    %187 = tpu.matmul %185, %186, %cst_47 {dimension_numbers = #tpu.dot_dimension_numbers<[1], [0], [0], [1], [0, 0, 1, 1], [], []>} : vector<16x32xbf16>, vector<32x32xbf16>, vector<16x32xf32> -> vector<16x32xf32>
    %c0_48 = arith.constant 0 : index
    %c0_49 = arith.constant 0 : index
    %188 = vector.load %arg8[%c0_48, %c0_49] : memref<1x32xf32, #tpu.memory_space<vmem>>, vector<1x32xf32>
    %189 = vector.broadcast %188 : vector<1x32xf32> to vector<16x32xf32>
    %190 = arith.addf %187, %189 : vector<16x32xf32>
    %cst_50 = arith.constant 0.000000e+00 : f32
    %191 = vector.broadcast %cst_50 : f32 to vector<16x32xf32>
    %192 = arith.maximumf %190, %191 : vector<16x32xf32>
    %193 = arith.truncf %192 : vector<16x32xf32> to vector<16x32xbf16>
    %c0_51 = arith.constant 0 : index
    %c0_52 = arith.constant 0 : index
    %194 = vector.load %arg9[%c0_51, %c0_52] : memref<32x8xbf16, #tpu.memory_space<vmem>>, vector<32x8xbf16>
    %cst_53 = arith.constant dense<0.000000e+00> : vector<16x8xf32>
    %195 = tpu.matmul %193, %194, %cst_53 {dimension_numbers = #tpu.dot_dimension_numbers<[1], [0], [0], [1], [0, 0, 1, 1], [], []>} : vector<16x32xbf16>, vector<32x8xbf16>, vector<16x8xf32> -> vector<16x8xf32>
    %c0_54 = arith.constant 0 : index
    %c0_55 = arith.constant 0 : index
    %196 = vector.load %arg10[%c0_54, %c0_55] : memref<1x8xf32, #tpu.memory_space<vmem>>, vector<1x8xf32>
    %197 = vector.broadcast %196 : vector<1x8xf32> to vector<16x8xf32>
    %198 = arith.addf %195, %197 : vector<16x8xf32>
    %199 = vector.extract_strided_slice %198 {offsets = [0, 0], sizes = [16, 1], strides = [1, 1]} : vector<16x8xf32> to vector<16x1xf32>
    %200 = math.tanh %199 : vector<16x1xf32>
    %201 = math.exp %200 : vector<16x1xf32>
    %202 = vector.extract_strided_slice %198 {offsets = [0, 1], sizes = [16, 1], strides = [1, 1]} : vector<16x8xf32> to vector<16x1xf32>
    %203 = math.exp %202 : vector<16x1xf32>
    %204 = arith.mulf %201, %203 : vector<16x1xf32>
    %205 = vector.extract_strided_slice %198 {offsets = [0, 2], sizes = [16, 1], strides = [1, 1]} : vector<16x8xf32> to vector<16x1xf32>
    %cst_56 = arith.constant 0.000000e+00 : f32
    %206 = vector.broadcast %cst_56 : f32 to vector<16x1xf32>
    %207 = arith.cmpf oge, %205, %206 : vector<16x1xf32>
    %cst_57 = arith.constant 1.000000e+00 : f32
    %cst_58 = arith.constant -1.000000e+00 : f32
    %208 = vector.broadcast %cst_57 : f32 to vector<16x1xf32>
    %209 = vector.broadcast %cst_58 : f32 to vector<16x1xf32>
    %210 = arith.select %207, %208, %209 : vector<16x1xi1>, vector<16x1xf32>
    %211 = math.absf %205 : vector<16x1xf32>
    %cst_59 = arith.constant 1.000000e-03 : f32
    %212 = vector.broadcast %cst_59 : f32 to vector<16x1xf32>
    %213 = arith.maximumf %211, %212 : vector<16x1xf32>
    %214 = arith.mulf %213, %210 : vector<16x1xf32>
    %c0_60 = arith.constant 0 : index
    %c0_61 = arith.constant 0 : index
    %215 = vector.load %arg2[%c0_60, %c0_61] : memref<16x1xf32, #tpu.memory_space<vmem>>, vector<16x1xf32>
    %216 = arith.mulf %214, %215 : vector<16x1xf32>
    %217 = math.exp %216 : vector<16x1xf32>
    %218 = arith.mulf %217, %204 : vector<16x1xf32>
    %219 = arith.subf %218, %204 : vector<16x1xf32>
    %220 = arith.divf %219, %214 : vector<16x1xf32>
    %221 = vector.extract_strided_slice %198 {offsets = [0, 3], sizes = [16, 5], strides = [1, 1]} : vector<16x8xf32> to vector<16x5xf32>
    %cst_62 = arith.constant dense<0xFF800000> : vector<16xf32>
    %222 = vector.multi_reduction <maximumf>, %221, %cst_62 [1] : vector<16x5xf32> to vector<16xf32>
    %223 = vector.shape_cast %222 : vector<16xf32> to vector<16x1xf32>
    %224 = vector.broadcast %223 : vector<16x1xf32> to vector<16x5xf32>
    %225 = arith.subf %221, %224 : vector<16x5xf32>
    %226 = math.exp %225 : vector<16x5xf32>
    %cst_63 = arith.constant dense<0.000000e+00> : vector<16xf32>
    %227 = vector.multi_reduction <add>, %226, %cst_63 [1] : vector<16x5xf32> to vector<16xf32>
    %228 = vector.shape_cast %227 : vector<16xf32> to vector<16x1xf32>
    %229 = vector.broadcast %228 : vector<16x1xf32> to vector<16x5xf32>
    %230 = arith.divf %226, %229 : vector<16x5xf32>
    %231 = tpu.concatenate %220, %218, %201, %230 in 1 : vector<16x1xf32>, vector<16x1xf32>, vector<16x1xf32>, vector<16x5xf32> -> vector<16x8xf32>
    %c0_64 = arith.constant 0 : index
    %c0_65 = arith.constant 0 : index
    %232 = vector.load %arg11[%c0_64, %c0_65] : memref<16x8xf32, #tpu.memory_space<vmem>>, vector<16x8xf32>
    tpu.vector_store %arg11[%c0_64, %c0_65], %231 {strides = array<i32>} : memref<16x8xf32, #tpu.memory_space<vmem>>, vector<16x8xf32>,
    return
  }
}

</mosaic_0001>

<bundles_post_ra>
// kernel: tpu_custom_call.1
= control target key start
LH: loop header
LB: loop body
LE: loop exit
PB: predicated region body
PF: predicated region fallthrough
CT: control target
= control target key end

     0   :  { %v1271_v0 = vmov 0   ;;  %v1272_v3 = vmov 0.0   ;;  %vm1273_vm0 = vmmov 0   ;;  %vm88_vm1 = vcmask 261120   ;;  %s1274_s13 = smov 64   ;;  %s1278_s27 = smov 2   ;;  %s1572_s0 = inlined_call_operand.vmem [shape: f32[16,1], index: 0, kind: input, shape index: {}]   ;;  %s1573_s5 = inlined_call_operand.vmem [shape: bf16[32,128], index: 5, kind: input, shape index: {}]   ;;  %s1574_s4 = inlined_call_operand.vmem [shape: bf16[32,128], index: 4, kind: input, shape index: {}]   ;;  %s1575_s3 = inlined_call_operand.vmem [shape: f32[1,32], index: 3, kind: input, shape index: {}]   ;;  %s1576_s1 = inlined_call_operand.vmem [shape: f32[16,32], index: 1, kind: input, shape index: {}]   ;;  %s1577_s6 = inlined_call_operand.vmem [shape: f32[1,128], index: 6, kind: input, shape index: {}]   ;;  %s1578_s7 = inlined_call_operand.vmem [shape: bf16[32,32], index: 7, kind: input, shape index: {}]   ;;  %s1579_s9 = inlined_call_operand.vmem [shape: bf16[32,8], index: 9, kind: input, shape index: {}]   ;;  %s1580_s8 = inlined_call_operand.vmem [shape: f32[1,32], index: 8, kind: input, shape index: {}]   ;;  %s1581_s10 = inlined_call_operand.vmem [shape: f32[1,8], index: 10, kind: input, shape index: {}]   ;;  %s1582_s2 = inlined_call_operand.vmem [shape: f32[16,1], index: 2, kind: input, shape index: {}]   ;;  %s1583_s11 = inlined_call_operand.vmem [shape: f32[16,8], index: 11, kind: output, shape index: {}]  }
   0x1   :  { %1186 = vset.pattern.permute.xlu0 %v1271_v0  ;;  %v39_v1 = vld [vmem:[%s1572_s0] sm:$0xff]  ;;  %v40_v2 = vld [vmem:[%s1572_s0 + $0x8] sm:$0xff]  ;;  %1096 = vmatprep.subr.bf16.mxu1 %v1272_v3  ;;  %vm749_vm2 = vcmask 1041408   ;;  %vm751_vm3 = vcmask 1043456   ;;  %vm753_vm4 = vcmask 1045504   ;;  %vm961_vm5 = vcmask 64536  }
   0x2   :  { %44 = vperm.xlu0 %1186, %v39_v1   ;;  %1088 = vmatprep.subr.bf16.mxu0 %v1272_v3  ;;  %v1352_v4 = vld [vmem:[%s1573_s5] sm:$0xff]   ;;  %v1361_v6 = vld [vmem:[%s1573_s5 + $0x8] sm:$0xff]   ;;  %vm982_vm8 = vcmask 39936   ;;  %vm1017_vm9 = vcmask 7168   ;;  %vm1020_vm10 = vcmask 15360   ;;  %vm1023_vm11 = vcmask 23552  }
   0x3   :  { %v1188_v5 = vld [vmem:[%s1574_s4] sm:$0xff]   ;;  %1097 = vmatpush3.bf16.msra.mxu1 %v1352_v4  ;;  %v1190_v7 = vld [vmem:[%s1574_s4 + $0x8] sm:$0xff]   ;;  %1100 = vmatprep.mubr.msk.bf16.mxu1 %vm1273_vm0, %v1272_v3  ;;  %vm1026_vm12 = vcmask 64512  }
   0x4   :  { %1089 = vmatpush3.bf16.msra.mxu0 %v1188_v5  ;;  %1098 = vmatprep.subr.bf16.mxu1 %v1272_v3  ;;  %v1033_v8 = vld [vmem:[%s1575_s3] ss:$0 sm:$0xff]  ;;  %v61_v12 = vld [vmem:[%s1576_s1 + $0x8] sm:$0xff] }
   0x5   :  { %1090 = vmatprep.subr.bf16.mxu0 %v1272_v3  ;;  %1092 = vmatprep.mubr.msk.bf16.mxu0 %vm1273_vm0, %v1272_v3  ;;  %v60_v11 = vld [vmem:[%s1576_s1] sm:$0xff] }
   0x6   :  { %49 = vperm.xlu0 %1186, %v40_v2   ;;  %v1034_v22 = vld [vmem:[%s1577_s6] ss:$0 sm:$0xff]  ;;  %s1275_s6 = smov 32  }
   0x7   :  { %1099 = vmatpush3.bf16.msra.mxu1 %v1361_v6 }
   0x8   :  { %1091 = vmatpush3.bf16.msra.mxu0 %v1190_v7  ;;  %1112 = vmatprep.subr.bf16.mxu1 %v1272_v3 }
   0x9   :  { %1104 = vmatprep.subr.bf16.mxu0 %v1272_v3 }
   0xa   :  { %1101 = vmatmul.mubr.bf16.vlgmr.msra.gmra.mrb[0].mxu1 %v1271_v0 }
   0xb   :  { %1113 = vmatpush3.bf16.msra.mxu1 %v1352_v4  ;;  %1116 = vmatprep.mubr.msk.bf16.mxu1 %vm1273_vm0, %v1272_v3 }
   0xc   :  { %1114 = vmatprep.subr.bf16.mxu1 %v1272_v3 }
   0xf   :  { %1115 = vmatpush3.bf16.msra.mxu1 %v1361_v6 }
  0x10   :  { %1128 = vmatprep.subr.bf16.mxu1 %v1272_v3 }
  0x81   :  { %v45_v9 = vpop.permute.xlu0 %44 }
  0x82   :  { %v58_v10 = vmul.f32 %v1033_v8, %v45_v9 }
  0x84   :  { %v62_v15 = vadd.f32 %v60_v11, %v58_v10 }
  0x85   :  { %v50_v13 = vpop.permute.xlu0 %49 }
  0x86   :  { %v59_v14 = vmul.f32 %v1033_v8, %v50_v13 }
  0x88   :  { %v63_v16 = vadd.f32 %v61_v12, %v59_v14 }
  0x8a   :  { %v64_v17 = vpack.c.bf16 %v63_v16, %v62_v15 }
  0x8c   :  { %1093 = vmatmul.mubr.msk.bf16.vlgmr.msra.gmra.mrb[0].mxu0 %vm88_vm1, %v64_v17 }
  0x8d   :  { %1105 = vmatpush3.bf16.msra.mxu0 %v1352_v4  ;;  %1108 = vmatprep.mubr.msk.bf16.mxu0 %vm1273_vm0, %v1272_v3 }
  0x8e   :  { %1106 = vmatprep.subr.bf16.mxu0 %v1272_v3 }
  0x91   :  { %1107 = vmatpush3.bf16.msra.mxu0 %v1361_v6 }
  0x92   :  { %1120 = vmatprep.subr.bf16.mxu0 %v1272_v3 }
  0xdd   :  { %v186_v18 = vpop.f32.mrb[0].mxu1 }
  0xde   :  { %v1102_v19 = vpop.f32.mrb[1].mxu1 }
  0xdf   :  { %v189_v20 = vpop.f32.mrb[2].mxu1 }
  0xe0   :  { %v1103_v21 = vpop.f32.mrb[3].mxu1 }
 0x15f   :  { %v126_v23 = vpop.f32.mrb[0].mxu0 }
 0x160   :  { %v1400_v24 = vadd.f32 %v1034_v22, %v126_v23  ;;  %v1094_v25 = vpop.f32.mrb[1].mxu0 }
 0x161   :  { %v129_v26 = vpop.f32.mrb[2].mxu0 }
 0x162   :  { %v192_v27 = vadd.f32 %v186_v18, %v1400_v24  ;;  %v1403_v28 = vadd.f32 %v1034_v22, %v129_v26  ;;  %v1095_v29 = vpop.f32.mrb[3].mxu0 }
 0x164   :  { %1195 = vtanh.f32 %v192_v27  ;;  %v193_v31 = vmul.f32 0.5, %v192_v27 }
 0x166   :  { %1197 = vtanh.f32 %v193_v31 }
 0x16e   :  { %v1196_v30 = vpop.eup %1195 }
 0x16f   :  { %200 = vrot.lane.b32.xlu1 %v1196_v30, %s1274_s13 }
 0x170   :  { %v1198_v32 = vpop.eup %1197 }
 0x171   :  { %v195_v33 = vadd.f32 1.0, %v1198_v32 }
 0x173   :  { %v196_v34 = vmul.f32 0.5, %v195_v33 }
 0x175   :  { %v198_v37 = vmul.f32 0.0, %v196_v34 }
 0x1e1   :  { %v201_v35 = vpop.permute.xlu1 %200 }
 0x1e2   :  { %v203_v36 = vmul.f32 %v201_v35, %v196_v34 }
 0x1e4   :  { %205 = vrot.lane.b32.xlu1 %v203_v36, %s1275_s6 }
 0x256   :  { %v206_v38 = vpop.permute.xlu1 %205 }
 0x257   :  { %v208_v39 = vadd.f32 %v206_v38, %v198_v37 }
 0x259   :  { %1199 = vtanh.f32 %v208_v39  ;;  %v272_v58 = vrot.slane %v208_v39, 6 }
 0x263   :  { %v1200_v40 = vpop.eup %1199 }
 0x264   :  { %211 = vrot.lane.b32.xlu0 %v1200_v40, %s1274_s13 }
 0x2d6   :  { %v212_v41 = vpop.permute.xlu0 %211 }
 0x2d7   :  { %v1408_v42 = vmul.f32 %v212_v41, %v196_v34 }
 0x2d9   :  { %v215_v43 = vpack.c.bf16 %v1408_v42, %v1408_v42 }
 0x2db   :  { %217 = vrot.lane.b32.xlu1 %v215_v43, %s1275_s6 }
 0x34d   :  { %v218_v44 = vpop.permute.xlu1 %217 }
 0x34e   :  { %1109 = vmatmul.mubr.msk.bf16.vlgmr.msra.gmra.mrb[4].mxu0 %vm88_vm1, %v218_v44 }
 0x34f   :  { %1121 = vmatpush3.bf16.msra.mxu0 %v1352_v4  ;;  %1124 = vmatprep.mubr.msk.bf16.mxu0 %vm1273_vm0, %v1272_v3 }
 0x350   :  { %1122 = vmatprep.subr.bf16.mxu0 %v1272_v3 }
 0x353   :  { %1123 = vmatpush3.bf16.msra.mxu0 %v1361_v6 }
 0x354   :  { %1136 = vmatprep.subr.bf16.mxu0 %v1272_v3 }
 0x421   :  { %v256_v45 = vpop.f32.mrb[4].mxu0 }
 0x422   :  { %v263_v46 = vrot.slane %v256_v45, 6  ;;  %v1110_v47 = vpop.f32.mrb[5].mxu0 }
 0x423   :  { %v259_v48 = vpop.f32.mrb[6].mxu0 }
 0x424   :  { %v265_v49 = vadd.f32 %v263_v46, %v1400_v24  ;;  %v1111_v50 = vpop.f32.mrb[7].mxu0 }
 0x426   :  { %1201 = vtanh.f32 %v265_v49  ;;  %v266_v52 = vmul.f32 0.5, %v265_v49 }
 0x428   :  { %1203 = vtanh.f32 %v266_v52 }
 0x430   :  { %v1202_v51 = vpop.eup %1201 }
 0x431   :  { %276 = vrot.lane.b32.xlu0 %v1202_v51, %s1274_s13 }
 0x432   :  { %v1204_v53 = vpop.eup %1203 }
 0x433   :  { %v268_v54 = vadd.f32 1.0, %v1204_v53 }
 0x435   :  { %v269_v55 = vmul.f32 0.5, %v268_v54 }
 0x437   :  { %v274_v59 = vmul.f32 %v272_v58, %v269_v55 }
 0x4a3   :  { %v277_v56 = vpop.permute.xlu0 %276 }
 0x4a4   :  { %v279_v57 = vmul.f32 %v277_v56, %v269_v55 }
 0x4a6   :  { %281 = vrot.lane.b32.xlu1 %v279_v57, %s1275_s6 }
 0x518   :  { %v282_v60 = vpop.permute.xlu1 %281 }
 0x519   :  { %v284_v61 = vadd.f32 %v282_v60, %v274_v59 }
 0x51b   :  { %1205 = vtanh.f32 %v284_v61  ;;  %v349_v20 = vrot.slane %v284_v61, 6 }
 0x525   :  { %v1206_v62 = vpop.eup %1205 }
 0x526   :  { %287 = vrot.lane.b32.xlu0 %v1206_v62, %s1274_s13 }
 0x598   :  { %v288_v63 = vpop.permute.xlu0 %287 }
 0x599   :  { %v290_v0 = vmul.f32 %v288_v63, %v269_v55 }
 0x59b   :  { %v291_v1 = vpack.c.bf16 %v290_v0, %v290_v0  ;;  %v750_v29 = vsel %vm749_vm2, %v1408_v42, %v290_v0 }
 0x59d   :  { %v293_v2 = vrot.slane %v291_v1, 1 }
 0x59f   :  { %294 = vrot.lane.b32.xlu1 %v293_v2, %s1275_s6 }
 0x611   :  { %v295_v5 = vpop.permute.xlu1 %294 }
 0x612   :  { %1117 = vmatmul.mubr.msk.bf16.vlgmr.msra.gmra.mrb[4].mxu1 %vm88_vm1, %v295_v5 }
 0x613   :  { %1129 = vmatpush3.bf16.msra.mxu1 %v1352_v4  ;;  %1132 = vmatprep.mubr.msk.bf16.mxu1 %vm1273_vm0, %v1272_v3 }
 0x614   :  { %1130 = vmatprep.subr.bf16.mxu1 %v1272_v3 }
 0x617   :  { %1131 = vmatpush3.bf16.msra.mxu1 %v1361_v6 }
 0x618   :  { %1144 = vmatprep.subr.bf16.mxu1 %v1272_v3 }
 0x6e5   :  { %v333_v7 = vpop.f32.mrb[4].mxu1 }
 0x6e6   :  { %v340_v8 = vrot.slane %v333_v7, 4  ;;  %v1118_v9 = vpop.f32.mrb[5].mxu1 }
 0x6e7   :  { %v336_v10 = vpop.f32.mrb[6].mxu1 }
 0x6e8   :  { %v342_v11 = vadd.f32 %v340_v8, %v1400_v24  ;;  %v1119_v12 = vpop.f32.mrb[7].mxu1 }
 0x6ea   :  { %1207 = vtanh.f32 %v342_v11  ;;  %v343_v14 = vmul.f32 0.5, %v342_v11 }
 0x6ec   :  { %1209 = vtanh.f32 %v343_v14 }
 0x6f4   :  { %v1208_v13 = vpop.eup %1207 }
 0x6f5   :  { %353 = vrot.lane.b32.xlu0 %v1208_v13, %s1274_s13 }
 0x6f6   :  { %v1210_v15 = vpop.eup %1209 }
 0x6f7   :  { %v345_v16 = vadd.f32 1.0, %v1210_v15 }
 0x6f9   :  { %v346_v17 = vmul.f32 0.5, %v345_v16 }
 0x6fb   :  { %v351_v21 = vmul.f32 %v349_v20, %v346_v17 }
 0x767   :  { %v354_v18 = vpop.permute.xlu0 %353 }
 0x768   :  { %v356_v19 = vmul.f32 %v354_v18, %v346_v17 }
 0x76a   :  { %358 = vrot.lane.b32.xlu1 %v356_v19, %s1275_s6 }
 0x7dc   :  { %v359_v22 = vpop.permute.xlu1 %358 }
 0x7dd   :  { %v361_v23 = vadd.f32 %v359_v22, %v351_v21 }
 0x7df   :  { %1211 = vtanh.f32 %v361_v23  ;;  %v426_v47 = vrot.slane %v361_v23, 6 }
 0x7e9   :  { %v1212_v25 = vpop.eup %1211 }
 0x7ea   :  { %364 = vrot.lane.b32.xlu0 %v1212_v25, %s1274_s13 }
 0x85c   :  { %v365_v26 = vpop.permute.xlu0 %364 }
 0x85d   :  { %v367_v27 = vmul.f32 %v365_v26, %v346_v17 }
 0x85f   :  { %v368_v30 = vpack.c.bf16 %v367_v27, %v367_v27  ;;  %v752_v31 = vsel %vm751_vm3, %v750_v29, %v367_v27 }
 0x861   :  { %v370_v32 = vrot.slane %v368_v30, 2 }
 0x863   :  { %371 = vrot.lane.b32.xlu1 %v370_v32, %s1275_s6 }
 0x8d5   :  { %v372_v33 = vpop.permute.xlu1 %371 }
 0x8d6   :  { %1125 = vmatmul.mubr.msk.bf16.vlgmr.msra.gmra.mrb[8].mxu0 %vm88_vm1, %v372_v33 }
 0x8d7   :  { %1137 = vmatpush3.bf16.msra.mxu0 %v1352_v4  ;;  %1140 = vmatprep.mubr.msk.bf16.mxu0 %vm1273_vm0, %v1272_v3 }
 0x8d8   :  { %1138 = vmatprep.subr.bf16.mxu0 %v1272_v3 }
 0x8db   :  { %1139 = vmatpush3.bf16.msra.mxu0 %v1361_v6 }
 0x8dc   :  { %1152 = vmatprep.subr.bf16.mxu0 %v1272_v3 }
 0x9a9   :  { %v410_v34 = vpop.f32.mrb[8].mxu0 }
 0x9aa   :  { %v417_v35 = vrot.slane %v410_v34, 2  ;;  %v1126_v36 = vpop.f32.mrb[9].mxu0 }
 0x9ab   :  { %v413_v37 = vpop.f32.mrb[10].mxu0 }
 0x9ac   :  { %v419_v38 = vadd.f32 %v417_v35, %v1400_v24  ;;  %v1127_v39 = vpop.f32.mrb[11].mxu0 }
 0x9ae   :  { %1213 = vtanh.f32 %v419_v38  ;;  %v420_v41 = vmul.f32 0.5, %v419_v38 }
 0x9b0   :  { %1215 = vtanh.f32 %v420_v41 }
 0x9b8   :  { %v1214_v40 = vpop.eup %1213 }
 0x9b9   :  { %430 = vrot.lane.b32.xlu0 %v1214_v40, %s1274_s13 }
 0x9ba   :  { %v1216_v42 = vpop.eup %1215 }
 0x9bb   :  { %v422_v43 = vadd.f32 1.0, %v1216_v42 }
 0x9bd   :  { %v423_v44 = vmul.f32 0.5, %v422_v43 }
 0x9bf   :  { %v428_v48 = vmul.f32 %v426_v47, %v423_v44 }
 0xa2b   :  { %v431_v45 = vpop.permute.xlu0 %430 }
 0xa2c   :  { %v433_v46 = vmul.f32 %v431_v45, %v423_v44 }
 0xa2e   :  { %435 = vrot.lane.b32.xlu1 %v433_v46, %s1275_s6 }
 0xaa0   :  { %v436_v49 = vpop.permute.xlu1 %435 }
 0xaa1   :  { %v438_v50 = vadd.f32 %v436_v49, %v428_v48 }
 0xaa3   :  { %1217 = vtanh.f32 %v438_v50  ;;  %v500_v8 = vrot.slane %v438_v50, 6 }
 0xaad   :  { %v1218_v24 = vpop.eup %1217 }
 0xaae   :  { %441 = vrot.lane.b32.xlu0 %v1218_v24, %s1274_s13 }
 0xb20   :  { %v442_v51 = vpop.permute.xlu0 %441 }
 0xb21   :  { %v444_v52 = vmul.f32 %v442_v51, %v423_v44 }
 0xb23   :  { %v445_v53 = vpack.c.bf16 %v444_v52, %v444_v52  ;;  %v1452_v54 = vsel %vm753_vm4, %v752_v31, %v444_v52 }
 0xb25   :  { %v447_v55 = vrot.slane %v445_v53, 3 }
 0xb27   :  { %448 = vrot.lane.b32.xlu1 %v447_v55, %s1275_s6 }
 0xb99   :  { %v449_v56 = vpop.permute.xlu1 %448 }
 0xb9a   :  { %1133 = vmatmul.mubr.msk.bf16.vlgmr.msra.gmra.mrb[8].mxu1 %vm88_vm1, %v449_v56 }
 0xb9b   :  { %1145 = vmatpush3.bf16.msra.mxu1 %v1352_v4  ;;  %1148 = vmatprep.mubr.msk.bf16.mxu1 %vm1273_vm0, %v1272_v3 }
 0xb9c   :  { %1146 = vmatprep.subr.bf16.mxu1 %v1272_v3 }
 0xb9f   :  { %1147 = vmatpush3.bf16.msra.mxu1 %v1361_v6 }
 0xba0   :  { %1160 = vmatprep.subr.bf16.mxu1 %v1272_v3 }
 0xc6d   :  { %v487_v57 = vpop.f32.mrb[8].mxu1 }
 0xc6e   :  { %v493_v58 = vadd.f32 %v487_v57, %v1403_v28  ;;  %v1134_v59 = vpop.f32.mrb[9].mxu1 }
 0xc6f   :  { %v490_v60 = vpop.f32.mrb[10].mxu1 }
 0xc70   :  { %1219 = vtanh.f32 %v493_v58  ;;  %v1135_v61 = vpop.f32.mrb[11].mxu1  ;;  %v494_v63 = vmul.f32 0.5, %v493_v58 }
 0xc72   :  { %1221 = vtanh.f32 %v494_v63 }
 0xc7a   :  { %v1220_v62 = vpop.eup %1219 }
 0xc7b   :  { %504 = vrot.lane.b32.xlu0 %v1220_v62, %s1274_s13 }
 0xc7c   :  { %v1222_v0 = vpop.eup %1221 }
 0xc7d   :  { %v496_v1 = vadd.f32 1.0, %v1222_v0 }
 0xc7f   :  { %v497_v2 = vmul.f32 0.5, %v496_v1 }
 0xc81   :  { %v502_v9 = vmul.f32 %v500_v8, %v497_v2 }
 0xced   :  { %v505_v5 = vpop.permute.xlu0 %504 }
 0xcee   :  { %v507_v7 = vmul.f32 %v505_v5, %v497_v2 }
 0xcf0   :  { %509 = vrot.lane.b32.xlu1 %v507_v7, %s1275_s6 }
 0xd62   :  { %v510_v10 = vpop.permute.xlu1 %509 }
 0xd63   :  { %v512_v11 = vadd.f32 %v510_v10, %v502_v9 }
 0xd65   :  { %1223 = vtanh.f32 %v512_v11  ;;  %v576_v30 = vrot.slane %v512_v11, 6 }
 0xd6f   :  { %v1224_v12 = vpop.eup %1223 }
 0xd70   :  { %515 = vrot.lane.b32.xlu0 %v1224_v12, %s1274_s13 }
 0xde2   :  { %v516_v13 = vpop.permute.xlu0 %515 }
 0xde3   :  { %v1466_v14 = vmul.f32 %v516_v13, %v497_v2 }
 0xde5   :  { %v519_v15 = vpack.c.bf16 %v1466_v14, %v1466_v14 }
 0xde7   :  { %521 = vrot.lane.b32.xlu1 %v519_v15, %s1275_s6 }
 0xe59   :  { %v522_v16 = vpop.permute.xlu1 %521 }
 0xe5a   :  { %1141 = vmatmul.mubr.msk.bf16.vlgmr.msra.gmra.mrb[12].mxu0 %vm88_vm1, %v522_v16 }
 0xe5b   :  { %1153 = vmatpush3.bf16.msra.mxu0 %v1352_v4  ;;  %1156 = vmatprep.mubr.msk.bf16.mxu0 %vm1273_vm0, %v1272_v3 }
 0xe5c   :  { %1154 = vmatprep.subr.bf16.mxu0 %v1272_v3 }
 0xe5f   :  { %1155 = vmatpush3.bf16.msra.mxu0 %v1361_v6 }
 0xe60   :  { %1168 = vmatprep.subr.bf16.mxu0 %v1272_v3 }
 0xf2d   :  { %v560_v17 = vpop.f32.mrb[12].mxu0 }
 0xf2e   :  { %v567_v18 = vrot.slane %v560_v17, 6  ;;  %v1142_v19 = vpop.f32.mrb[13].mxu0 }
 0xf2f   :  { %v563_v20 = vpop.f32.mrb[14].mxu0 }
 0xf30   :  { %v569_v21 = vadd.f32 %v567_v18, %v1403_v28  ;;  %v1143_v22 = vpop.f32.mrb[15].mxu0 }
 0xf32   :  { %1225 = vtanh.f32 %v569_v21  ;;  %v570_v4 = vmul.f32 0.5, %v569_v21  ;;  %v1192_v21 = vld [vmem:[%s1578_s7 + $0x8] sm:$0xff]  }
 0xf34   :  { %1227 = vtanh.f32 %v570_v4 }
 0xf3c   :  { %v1226_v23 = vpop.eup %1225 }
 0xf3d   :  { %580 = vrot.lane.b32.xlu0 %v1226_v23, %s1274_s13 }
 0xf3e   :  { %v1228_v25 = vpop.eup %1227 }
 0xf3f   :  { %v572_v26 = vadd.f32 1.0, %v1228_v25 }
 0xf41   :  { %v573_v27 = vmul.f32 0.5, %v572_v26 }
 0xf43   :  { %v578_v31 = vmul.f32 %v576_v30, %v573_v27 }
 0xfaf   :  { %v581_v29 = vpop.permute.xlu0 %580 }
 0xfb0   :  { %v583_v6 = vmul.f32 %v581_v29, %v573_v27  ;;  %v1193_v29 = vld [vmem:[%s1579_s9] sm:$0xff]  }
 0xfb2   :  { %585 = vrot.lane.b32.xlu1 %v583_v6, %s1275_s6  ;;  %v1194_v6 = vld [vmem:[%s1579_s9 + $0x8] sm:$0xff]   ;;  %s1277_s9 = smov 125  }
0x1024   :  { %v586_v32 = vpop.permute.xlu1 %585 }
0x1025   :  { %v588_v33 = vadd.f32 %v586_v32, %v578_v31 }
0x1027   :  { %1229 = vtanh.f32 %v588_v33  ;;  %v653_v52 = vrot.slane %v588_v33, 6 }
0x1031   :  { %v1230_v34 = vpop.eup %1229 }
0x1032   :  { %591 = vrot.lane.b32.xlu0 %v1230_v34, %s1274_s13 }
0x10a4   :  { %v592_v35 = vpop.permute.xlu0 %591 }
0x10a5   :  { %v594_v36 = vmul.f32 %v592_v35, %v573_v27 }
0x10a7   :  { %v595_v37 = vpack.c.bf16 %v594_v36, %v594_v36  ;;  %v755_v60 = vsel %vm749_vm2, %v1466_v14, %v594_v36 }
0x10a9   :  { %v597_v38 = vrot.slane %v595_v37, 1 }
0x10ab   :  { %598 = vrot.lane.b32.xlu1 %v597_v38, %s1275_s6 }
0x111d   :  { %v599_v39 = vpop.permute.xlu1 %598 }
0x111e   :  { %1149 = vmatmul.mubr.msk.bf16.vlgmr.msra.gmra.mrb[12].mxu1 %vm88_vm1, %v599_v39 }
0x111f   :  { %1164 = vmatprep.mubr.msk.bf16.mxu1 %vm1273_vm0, %v1272_v3 }
0x11f1   :  { %v637_v40 = vpop.f32.mrb[12].mxu1 }
0x11f2   :  { %v644_v41 = vrot.slane %v637_v40, 4  ;;  %v1150_v42 = vpop.f32.mrb[13].mxu1 }
0x11f3   :  { %v640_v43 = vpop.f32.mrb[14].mxu1 }
0x11f4   :  { %v646_v44 = vadd.f32 %v644_v41, %v1403_v28  ;;  %v1151_v45 = vpop.f32.mrb[15].mxu1 }
0x11f6   :  { %1231 = vtanh.f32 %v646_v44  ;;  %v647_v47 = vmul.f32 0.5, %v646_v44 }
0x11f8   :  { %1233 = vtanh.f32 %v647_v47 }
0x1200   :  { %v1232_v46 = vpop.eup %1231 }
0x1201   :  { %657 = vrot.lane.b32.xlu0 %v1232_v46, %s1274_s13 }
0x1202   :  { %v1234_v48 = vpop.eup %1233 }
0x1203   :  { %v649_v49 = vadd.f32 1.0, %v1234_v48 }
0x1205   :  { %v650_v50 = vmul.f32 0.5, %v649_v49 }
0x1207   :  { %v655_v53 = vmul.f32 %v653_v52, %v650_v50 }
0x1273   :  { %v658_v24 = vpop.permute.xlu0 %657 }
0x1274   :  { %v660_v51 = vmul.f32 %v658_v24, %v650_v50 }
0x1276   :  { %662 = vrot.lane.b32.xlu1 %v660_v51, %s1275_s6 }
0x12e8   :  { %v663_v55 = vpop.permute.xlu1 %662 }
0x12e9   :  { %v665_v56 = vadd.f32 %v663_v55, %v655_v53 }
0x12eb   :  { %1235 = vtanh.f32 %v665_v56  ;;  %v730_v17 = vrot.slane %v665_v56, 6 }
0x12f5   :  { %v1236_v57 = vpop.eup %1235 }
0x12f6   :  { %668 = vrot.lane.b32.xlu0 %v1236_v57, %s1274_s13 }
0x1368   :  { %v669_v58 = vpop.permute.xlu0 %668 }
0x1369   :  { %v671_v59 = vmul.f32 %v669_v58, %v650_v50 }
0x136b   :  { %v672_v61 = vpack.c.bf16 %v671_v59, %v671_v59  ;;  %v756_v62 = vsel %vm751_vm3, %v755_v60, %v671_v59 }
0x136d   :  { %v674_v63 = vrot.slane %v672_v61, 2 }
0x136f   :  { %675 = vrot.lane.b32.xlu1 %v674_v63, %s1275_s6  ;;  %v929_v63 = vld [vmem:[%s1582_s2] sm:$0xff] }
0x13e1   :  { %v676_v0 = vpop.permute.xlu1 %675 }
0x13e2   :  { %1157 = vmatmul.mubr.msk.bf16.vlgmr.msra.gmra.mrb[16].mxu0 %vm88_vm1, %v676_v0 }
0x13e3   :  { %1172 = vmatprep.mubr.msk.bf16.mxu0 %vm1273_vm0, %v1272_v3  ;;  %1169 = vmatpush3.bf16.msra.mxu0 %v1193_v29 }
0x13e4   :  { %1170 = vmatprep.subr.bf16.mxu0 %v1272_v3 }
0x13e7   :  { %1171 = vmatpush3.bf16.msra.mxu0 %v1194_v6 }
0x14b5   :  { %v714_v1 = vpop.f32.mrb[16].mxu0 }
0x14b6   :  { %v721_v2 = vrot.slane %v714_v1, 2  ;;  %v1158_v5 = vpop.f32.mrb[17].mxu0  ;;  %v930_v1 = vld [vmem:[%s1582_s2 + $0x8] sm:$0xff]  ;;  %s1280_s2 = smov 126  }
0x14b7   :  { %v717_v7 = vpop.f32.mrb[18].mxu0 }
0x14b8   :  { %v723_v8 = vadd.f32 %v721_v2, %v1403_v28  ;;  %v1159_v9 = vpop.f32.mrb[19].mxu0  ;;  %v1191_v28 = vld [vmem:[%s1578_s7] sm:$0xff]  }
0x14b9   :  { %1161 = vmatpush3.bf16.msra.mxu1 %v1191_v28 }
0x14ba   :  { %1237 = vtanh.f32 %v723_v8  ;;  %v724_v11 = vmul.f32 0.5, %v723_v8  ;;  %1162 = vmatprep.subr.bf16.mxu1 %v1272_v3  ;;  %v1051_v3 = vld [vmem:[%s1581_s10] ss:$0 sm:$0xff] }
0x14bc   :  { %1239 = vtanh.f32 %v724_v11 }
0x14bd   :  { %1163 = vmatpush3.bf16.msra.mxu1 %v1192_v21 }
0x14c4   :  { %v1238_v10 = vpop.eup %1237 }
0x14c5   :  { %734 = vrot.lane.b32.xlu0 %v1238_v10, %s1274_s13 }
0x14c6   :  { %v1240_v12 = vpop.eup %1239 }
0x14c7   :  { %v726_v13 = vadd.f32 1.0, %v1240_v12 }
0x14c9   :  { %v727_v14 = vmul.f32 0.5, %v726_v13 }
0x14cb   :  { %v732_v18 = vmul.f32 %v730_v17, %v727_v14 }
0x1537   :  { %v735_v15 = vpop.permute.xlu0 %734 }
0x1538   :  { %v737_v16 = vmul.f32 %v735_v15, %v727_v14 }
0x153a   :  { %739 = vrot.lane.b32.xlu1 %v737_v16, %s1275_s6  ;;  %v1279_v16 = vmov -1.0  }
0x15ac   :  { %v740_v19 = vpop.permute.xlu1 %739 }
0x15ad   :  { %v742_v20 = vadd.f32 %v740_v19, %v732_v18 }
0x15af   :  { %1241 = vtanh.f32 %v742_v20 }
0x15b9   :  { %v1242_v22 = vpop.eup %1241 }
0x15ba   :  { %745 = vrot.lane.b32.xlu0 %v1242_v22, %s1274_s13 }
0x162c   :  { %v746_v23 = vpop.permute.xlu0 %745 }
0x162d   :  { %v748_v4 = vmul.f32 %v746_v23, %v727_v14 }
0x162f   :  { %v757_v25 = vsel %vm753_vm4, %v756_v62, %v748_v4 }
0x1630   :  { %v758_v26 = vpack.c.bf16 %v757_v25, %v1452_v54  ;;  %v1047_v54 = vld [vmem:[%s1580_s8] ss:$0 sm:$0xff]  ;;  %s1276_s8 = smov 127  }
0x1632   :  { %771 = vrot.lane.b32.xlu1 %v758_v26, %s1275_s6 }
0x16a4   :  { %v772_v27 = vpop.permute.xlu1 %771 }
0x16a5   :  { %1165 = vmatmul.mubr.msk.bf16.vlgmr.msra.gmra.mrb[16].mxu1 %vm88_vm1, %v772_v27 }
0x1778   :  { %v822_v30 = vpop.f32.mrb[16].mxu1 }
0x1779   :  { %v823_v31 = vadd.f32 %v1047_v54, %v822_v30  ;;  %v1166_v32 = vpop.f32.mrb[17].mxu1 }
0x177a   :  { %v825_v33 = vpop.f32.mrb[18].mxu1 }
0x177b   :  { %v826_v34 = vadd.f32 %v1047_v54, %v825_v33  ;;  %v1167_v35 = vpop.f32.mrb[19].mxu1  ;;  %v829_v36 = vmax.f32 %v823_v31, 0.0 }
0x177d   :  { %v830_v37 = vmax.f32 %v826_v34, 0.0 }
0x177f   :  { %v831_v38 = vpack.c.bf16 %v830_v37, %v829_v36 }
0x1781   :  { %1173 = vmatmul.mubr.msk.bf16.vlgmr.msra.gmra.mrb[20].mxu0 %vm88_vm1, %v831_v38 }
0x1854   :  { %v892_v39 = vpop.f32.mrb[20].mxu0 }
0x1855   :  { %v1526_v40 = vadd.f32 %v1051_v3, %v892_v39  ;;  %v1174_v41 = vpop.f32.mrb[21].mxu0 }
0x1856   :  { %v895_v42 = vpop.f32.mrb[22].mxu0 }
0x1857   :  { %v1528_v43 = vadd.f32 %v1051_v3, %v895_v42  ;;  %v1175_v44 = vpop.f32.mrb[23].mxu0  ;;  %v962_v45 = vsel %vm961_vm5, %v1526_v40, -inf  ;;  %v905_v48 = vmul.f32 1.442695, %v1526_v40  ;;  %v923_v10 = vand.u32 2147483647, %v1526_v40 }
0x1858   :  { %963 = vmax.xlane.f32.xlu0 %v962_v45  ;;  %vm919_vm6 = vcmp.ge.f32.partialorder %v1526_v40, 0.0 }
0x1859   :  { %v965_v46 = vsel %vm961_vm5, %v1528_v43, -inf  ;;  %v907_v47 = vmul.f32 1.442695, %v1528_v43  ;;  %v924_v11 = vand.u32 2147483647, %v1528_v43  ;;  %vm920_vm7 = vcmp.ge.f32.partialorder %v1528_v43, 0.0 }
0x185a   :  { %966 = vmax.xlane.f32.xlu1 %v965_v46  ;;  %v925_v12 = vmax.f32 %v923_v10, 0.001  ;;  %v921_v17 = vsel %vm919_vm6, 1.0, %v1279_v16  ;;  %v922_v20 = vsel %vm920_vm7, 1.0, %v1279_v16 }
0x185b   :  { %1243 = vpow2.f32 %v907_v47  ;;  %v926_v14 = vmax.f32 %v924_v11, 0.001 }
0x185c   :  { %1245 = vpow2.f32 %v905_v48  ;;  %v927_v18 = vmul.f32 %v925_v12, %v921_v17 }
0x185d   :  { %1247 = vtanh.f32 %v1526_v40  ;;  %v928_v21 = vmul.f32 %v926_v14, %v922_v20 }
0x185e   :  { %1249 = vtanh.f32 %v1528_v43 }
0x1865   :  { %v1244_v49 = vpop.eup %1243 }
0x1866   :  { %v1246_v50 = vpop.eup %1245 }
0x1867   :  { %v1248_v56 = vpop.eup %1247 }
0x1868   :  { %v1250_v58 = vpop.eup %1249  ;;  %v901_v59 = vmul.f32 1.442695, %v1248_v56 }
0x1869   :  { %v903_v60 = vmul.f32 1.442695, %v1250_v58 }
0x186b   :  { %913 = vrot.lane.b32.xlu1 %v1244_v49, %s1276_s8 }
0x186e   :  { %911 = vrot.lane.b32.xlu0 %v1246_v50, %s1276_s8 }
0x18e5   :  { %v964_v24 = vpop.xlane.xlu0 %963 }
0x18e6   :  { %v968_v51 = vsub.f32 %v1526_v40, %v964_v24 }
0x18e7   :  { %v967_v52 = vpop.xlane.xlu1 %966 }
0x18e8   :  { %v970_v53 = vmul.f32 1.442695, %v968_v51  ;;  %v969_v55 = vsub.f32 %v1528_v43, %v967_v52 }
0x18e9   :  { %v912_v0 = vpop.permute.xlu0 %911 }
0x18ea   :  { %1251 = vpow2.f32 %v970_v53  ;;  %v972_v57 = vmul.f32 1.442695, %v969_v55 }
0x18eb   :  { %v914_v5 = vpop.permute.xlu1 %913 }
0x18ec   :  { %1253 = vpow2.f32 %v972_v57 }
0x18ed   :  { %1255 = vpow2.f32 %v901_v59 }
0x18ee   :  { %1257 = vpow2.f32 %v903_v60 }
0x18f4   :  { %v1540_v61 = vpop.eup %1251 }
0x18f5   :  { %976 = vrot.lane.b32.xlu0 %v1540_v61, %s1277_s9 }
0x18f6   :  { %v1543_v62 = vpop.eup %1253 }
0x18f7   :  { %978 = vrot.lane.b32.xlu1 %v1543_v62, %s1277_s9  ;;  %v1256_v2 = vpop.eup %1255 }
0x18f8   :  { %v917_v7 = vmul.f32 %v1256_v2, %v912_v0  ;;  %v1258_v8 = vpop.eup %1257 }
0x18f9   :  { %933 = vrot.lane.b32.xlu0 %v929_v63, %s1278_s27  ;;  %v918_v9 = vmul.f32 %v1258_v8, %v914_v5 }
0x18fb   :  { %935 = vrot.lane.b32.xlu1 %v930_v1, %s1278_s27 }
0x18fd   :  { %947 = vrot.lane.b32.xlu0 %v917_v7, %s1278_s27 }
0x18ff   :  { %949 = vrot.lane.b32.xlu1 %v918_v9, %s1278_s27 }
0x1967   :  { %v977_v13 = vpop.permute.xlu0 %976 }
0x1968   :  { %v983_v37 = vsel %vm982_vm8, %v977_v13, 0.0 }
0x1969   :  { %v979_v15 = vpop.permute.xlu1 %978 }
0x196a   :  { %v986_v38 = vsel %vm982_vm8, %v979_v15, 0.0 }
0x196b   :  { %v934_v19 = vpop.permute.xlu0 %933 }
0x196c   :  { %v939_v28 = vmul.f32 %v934_v19, %v927_v18 }
0x196d   :  { %v936_v22 = vpop.permute.xlu1 %935 }
0x196e   :  { %v941_v23 = vmul.f32 1.442695, %v939_v28  ;;  %v940_v4 = vmul.f32 %v936_v22, %v928_v21 }
0x196f   :  { %v948_v27 = vpop.permute.xlu0 %947 }
0x1970   :  { %1259 = vpow2.f32 %v941_v23  ;;  %v943_v25 = vmul.f32 1.442695, %v940_v4 }
0x1971   :  { %v950_v54 = vpop.permute.xlu1 %949 }
0x1972   :  { %1261 = vpow2.f32 %v943_v25 }
0x1973   :  { %1263 = vrcp.f32 %v927_v18 }
0x1974   :  { %1265 = vrcp.f32 %v928_v21 }
0x197a   :  { %v1260_v26 = vpop.eup %1259 }
0x197b   :  { %v953_v29 = vmul.f32 %v1260_v26, %v948_v27 }
0x197c   :  { %v1262_v6 = vpop.eup %1261 }
0x197d   :  { %v955_v30 = vsub.f32 %v953_v29, %v948_v27  ;;  %v954_v31 = vmul.f32 %v1262_v6, %v950_v54  ;;  %1003 = vrot.lane.b32.xlu0 %v953_v29, %s1276_s8  ;;  %v1264_v32 = vpop.eup %1263 }
0x197e   :  { %v1266_v35 = vpop.eup %1265 }
0x197f   :  { %v958_v33 = vmul.f32 %v1264_v32, %v955_v30  ;;  %v956_v34 = vsub.f32 %v954_v31, %v950_v54  ;;  %1005 = vrot.lane.b32.xlu1 %v954_v31, %s1276_s8 }
0x1981   :  { %v960_v36 = vmul.f32 %v1266_v35, %v956_v34  ;;  %995 = vrot.lane.b32.xlu0 %v958_v33, %s1280_s2 }
0x1983   :  { %997 = vrot.lane.b32.xlu1 %v960_v36, %s1280_s2 }
0x19a0   :  { %984 = vadd.xlane.f32.xlu0 %v983_v37 }
0x19a7   :  { %987 = vadd.xlane.f32.xlu1 %v986_v38 }
0x19b6   :  { %1011 = vrot.lane.b32.xlu0 %v1256_v2, %s1278_s27 }
0x19b8   :  { %1013 = vrot.lane.b32.xlu1 %v1258_v8, %s1278_s27 }
0x19ef   :  { %v1004_v3 = vpop.permute.xlu0 %1003 }
0x19f1   :  { %v1006_v40 = vpop.permute.xlu1 %1005 }
0x19f3   :  { %v996_v39 = vpop.permute.xlu0 %995 }
0x19f4   :  { %v1018_v46 = vsel %vm1017_vm9, %v996_v39, %v1004_v3 }
0x19f5   :  { %v998_v42 = vpop.permute.xlu1 %997 }
0x19f6   :  { %v1019_v51 = vsel %vm1017_vm9, %v998_v42, %v1006_v40 }
0x1a2d   :  { %v985_v41 = vpop.xlane.xlu0 %984 }
0x1a2e   :  { %1267 = vrcp.f32 %v985_v41 }
0x1a31   :  { %v1012_v44 = vpop.permute.xlu0 %1011 }
0x1a32   :  { %v1021_v48 = vsel %vm1020_vm10, %v1018_v46, %v1012_v44 }
0x1a34   :  { %v988_v43 = vpop.xlane.xlu1 %987 }
0x1a35   :  { %1269 = vrcp.f32 %v988_v43 }
0x1a38   :  { %v1268_v45 = vpop.eup %1267  ;;  %v1014_v50 = vpop.permute.xlu1 %1013 }
0x1a39   :  { %v990_v47 = vmul.f32 %v1268_v45, %v1540_v61  ;;  %v1022_v53 = vsel %vm1020_vm10, %v1019_v51, %v1014_v50 }
0x1a3b   :  { %v1024_v49 = vsel %vm1023_vm11, %v1021_v48, %v990_v47 }
0x1a3c   :  { %1027 = vst.msk [vmem:[%s1583_s11] sm:$0xff] %vm1026_vm12, %v1024_v49 }
0x1a3f   :  { %v1270_v24 = vpop.eup %1269 }
0x1a40   :  { %v992_v52 = vmul.f32 %v1270_v24, %v1543_v62 }
0x1a42   :  { %v1025_v55 = vsel %vm1023_vm11, %v1022_v53, %v992_v52 }
0x1a43   :  { %1028 = vst.msk [vmem:[%s1583_s11 + $0x8] sm:$0xff] %vm1026_vm12, %v1025_v55 }

</bundles_post_ra>
